<compile_context>
chip_gen: v7x
topology: tpu7x:2x2x1
jax: 0.10.0
libtpu: 0.0.40
codegen_flags: <defaults>
</compile_context>

<pallas_src>
import functools
import math

import jax
import jax.numpy as jnp
from jax.experimental import pallas as pl
from jax.experimental.pallas import tpu as pltpu


def _cdiv(a, b):
    return (a + b - 1) // b


def _dyn_perf_partial_kernel(true_ref, pred_ref, s1_ref, s2_ref, sse_ref, *,
                             rows_total, cpc, tb, tsub, nsub, acc_rows, need_mask):
    c = pl.program_id(0)            # core-split index  (parallel axis)
    k = pl.program_id(1)            # chunk index within this core (arbitrary axis)

    @pl.when(k == 0)
    def _init():
        s1_ref[...] = jnp.zeros_like(s1_ref)
        s2_ref[...] = jnp.zeros_like(s2_ref)
        sse_ref[...] = jnp.zeros_like(sse_ref)

    # Unclamped global (folded) row offset of this block; used only for masking.
    base = (c * cpc + k) * tb

    def accumulate(row0):
        p = pred_ref[pl.ds(row0, tsub), :].astype(jnp.float32)
        t = true_ref[pl.ds(row0, tsub), :].astype(jnp.float32)
        if need_mask:
            rid = jax.lax.broadcasted_iota(jnp.int32, (tsub, 1), 0) + (base + row0)
            valid = rid < rows_total
            p = jnp.where(valid, p, 0.0)
            t = jnp.where(valid, t, 0.0)
        d = p - t
        w = p.shape[-1]
        if acc_rows == 8:
            # Group-of-8-sublane partial sums: pure VALU vreg adds; the final
            # cross-sublane reduce is deferred to the wrapper epilogue.
            fold = lambda x: x.reshape(tsub // 8, 8, w).sum(axis=0)
        else:
            fold = lambda x: jnp.sum(x, axis=0, keepdims=True)
        s1_ref[0] += fold(p)
        s2_ref[0] += fold(p * p)
        sse_ref[0] += fold(d * d)

    if nsub == 1:
        accumulate(0)
    else:
        @pl.loop(0, nsub)
        def _(j):
            accumulate(pl.multiple_of(j * tsub, tsub))


def dynamics_performance_loss(true_next_state, predicted_next_state,
                              lambda_var: float = 0.001):
    """Pallas TPU implementation of DynamicsPerformanceLoss.forward."""
    assert true_next_state.shape == predicted_next_state.shape
    assert true_next_state.ndim == 2, "expected (batch, state_dim)"
    B, D = true_next_state.shape

    itemsize = max(jnp.dtype(true_next_state.dtype).itemsize,
                   jnp.dtype(predicted_next_state.dtype).itemsize)
    # Sublane granularity: 8 rows for 4-byte, 16 for bf16, 32 for int8/fp8.
    mult = max(8, 32 // itemsize)

    # --- lane-density fold: (B, D) -> (B//g, g*D) with g*D % 128 == 0 -------
    g = 1
    if D < 128:
        gg = 128 // math.gcd(D, 128)
        if gg > 1 and B % gg == 0:
            g = gg
    W = g * D
    R = B // g                      # folded row count (each folded row = g rows)
    true_v = true_next_state.reshape(R, W)
    pred_v = predicted_next_state.reshape(R, W)

    # --- tiling: ~128 KiB f32 sub-chunks, ~4 MiB per-input DMA blocks -------
    tsub = max(mult, (131072 // (W * 4)) // mult * mult)
    if R <= tsub:
        tsub = tb = R               # one block == the full (folded) batch
        nsub = 1
    else:
        nsub = max(1, min((4 * 1024 * 1024) // (tsub * W * itemsize), R // tsub))
        tb = nsub * tsub            # tb <= R; last block may be ragged (masked)

    n_chunks = _cdiv(R, tb)
    nc = 2 if n_chunks >= 2 else 1  # v7x: split the chunk axis over both TCs
    cpc = _cdiv(n_chunks, nc)
    need_mask = (nc * cpc * tb) != R
    max_blk = n_chunks - 1
    acc_rows = 8 if (tsub % 8 == 0) else 1

    kernel = functools.partial(
        _dyn_perf_partial_kernel,
        rows_total=R, cpc=cpc, tb=tb, tsub=tsub, nsub=nsub,
        acc_rows=acc_rows, need_mask=need_mask)

    # Virtual / out-of-range grid steps are clamped onto the last real block;
    # the in-kernel row mask zeroes their contribution.
    in_spec = pl.BlockSpec((tb, W),
                           lambda c, k: (jnp.minimum(c * cpc + k, max_blk), 0))
    out_spec = pl.BlockSpec((1, acc_rows, W), lambda c, k: (c, 0, 0))
    part_shape = jax.ShapeDtypeStruct((nc, acc_rows, W), jnp.float32)

    # 2 inputs x 2 pipeline buffers + headroom; keep <= 48 MiB for v7x's 64 MiB VMEM.
    vmem_limit = int(min(48 * 1024 * 1024,
                         max(16 * 1024 * 1024,
                             2 * 2 * tb * W * itemsize + 8 * 1024 * 1024)))

    s1_p, s2_p, sse_p = pl.pallas_call(
        kernel,
        out_shape=(part_shape, part_shape, part_shape),
        grid_spec=pltpu.PrefetchScalarGridSpec(
            num_scalar_prefetch=0,
            grid=(nc, cpc),
            in_specs=[in_spec, in_spec],
            out_specs=[out_spec, out_spec, out_spec],
        ),
        compiler_params=pltpu.CompilerParams(
            dimension_semantics=("parallel", "arbitrary"),
            vmem_limit_bytes=vmem_limit,
        ),
    )(true_v, pred_v)

    # --- tiny plain-JAX epilogue: combine per-core / per-sublane / lane-group
    #     partials (arrays are only (nc, acc_rows, g*D) f32) --------------------
    s1 = s1_p.reshape(-1, D).sum(axis=0)     # per-column sum(pred)
    s2 = s2_p.reshape(-1, D).sum(axis=0)     # per-column sum(pred^2)
    sse = sse_p.sum()                        # total sum((pred-true)^2)

    bf = jnp.float32(B)
    mse = sse / (bf * jnp.float32(D))
    # torch.var default is unbiased (ddof=1); B == 1 -> 0/0 -> NaN, like torch.
    # TODO(synk): for |mean| >> std the E[x^2]-E[x]^2 form loses precision; a
    # Welford/Chan per-chunk centered combine would fix it at small extra cost.
    var_cols = (s2 - s1 * s1 / bf) / (bf - 1.0)
    return mse + jnp.float32(lambda_var) * jnp.mean(var_cols)


if __name__ == "__main__":
    key = jax.random.PRNGKey(0)
    k1, k2, k3, k4 = jax.random.split(key, 4)
    lambda_var = 0.001
    loss_fn = jax.jit(functools.partial(dynamics_performance_loss,
                                        lambda_var=lambda_var))

    # --- small shape implied by the module: (batch, state_dim) --------------
    B, D = 8, 32
    true_s = jax.random.normal(k1, (B, D), dtype=jnp.float32)
    pred_s = jax.random.normal(k2, (B, D), dtype=jnp.float32)
    loss = jax.block_until_ready(loss_fn(true_s, pred_s))
    ref = (jnp.mean((pred_s - true_s) ** 2)
           + lambda_var * jnp.mean(jnp.var(pred_s, axis=0, ddof=1)))
    assert jnp.allclose(loss, ref, rtol=1e-5, atol=1e-5), (loss, ref)

    # --- larger shape: exercises lane folding, multi-chunk grid, dual-core
    #     split, ragged-tail masking and the big-block inner loop ------------
    B2, D2 = 65560, 32
    true_l = jax.random.normal(k3, (B2, D2), dtype=jnp.float32)
    pred_l = 0.5 * jax.random.normal(k4, (B2, D2), dtype=jnp.float32) + 0.25
    loss2 = jax.block_until_ready(loss_fn(true_l, pred_l))
    ref2 = (jnp.mean((pred_l - true_l) ** 2)
            + lambda_var * jnp.mean(jnp.var(pred_l, axis=0, ddof=1)))
    assert jnp.allclose(loss2, ref2, rtol=1e-3, atol=1e-3), (loss2, ref2)

    print("KERNEL_OK")
</pallas_src>

<mosaic_0001>
module attributes {stable_mosaic.version = 11 : i64} {
  func.func @_dyn_perf_partial_kernel(%arg0: i32, %arg1: i32, %arg2: memref<2x128xf32, #tpu.memory_space<vmem>>, %arg3: memref<2x128xf32, #tpu.memory_space<vmem>>, %arg4: memref<1x1x128xf32, #tpu.memory_space<vmem>>, %arg5: memref<1x1x128xf32, #tpu.memory_space<vmem>>, %arg6: memref<1x1x128xf32, #tpu.memory_space<vmem>>) attributes {dimension_semantics = [#tpu.dimension_semantics<parallel>, #tpu.dimension_semantics<arbitrary>], iteration_bounds = array<i64: 1, 1>, scalar_prefetch = 0 : i64, scratch_operands = 0 : i64, tpu.core_type = #tpu.core_type<tc>, window_params = [{transform_indices = @transform_0, window_bounds = array<i64: 2, 128>}, {transform_indices = @transform_1, window_bounds = array<i64: 2, 128>}, {transform_indices = @transform_2, window_bounds = array<i64: 1, 1, 128>}, {transform_indices = @transform_3, window_bounds = array<i64: 1, 1, 128>}, {transform_indices = @transform_4, window_bounds = array<i64: 1, 1, 128>}]} {
    %c0_i32 = arith.constant 0 : i32
    %0 = arith.cmpi eq, %arg1, %c0_i32 : i32
    %1 = arith.extui %0 : i1 to i32
    %c0_i32_0 = arith.constant 0 : i32
    %2 = arith.cmpi ne, %1, %c0_i32_0 : i32
    scf.if %2 {
      %cst_24 = arith.constant 0.000000e+00 : f32
      %32 = vector.broadcast %cst_24 : f32 to vector<1x1x128xf32>
      %c0_25 = arith.constant 0 : index
      %c0_26 = arith.constant 0 : index
      %c0_27 = arith.constant 0 : index
      %33 = vector.load %arg4[%c0_25, %c0_26, %c0_27] : memref<1x1x128xf32, #tpu.memory_space<vmem>>, vector<1x1x128xf32>
      tpu.vector_store %arg4[%c0_25, %c0_26, %c0_27], %32 {strides = array<i32>} : memref<1x1x128xf32, #tpu.memory_space<vmem>>, vector<1x1x128xf32>,
      %cst_28 = arith.constant 0.000000e+00 : f32
      %34 = vector.broadcast %cst_28 : f32 to vector<1x1x128xf32>
      %c0_29 = arith.constant 0 : index
      %c0_30 = arith.constant 0 : index
      %c0_31 = arith.constant 0 : index
      %35 = vector.load %arg5[%c0_29, %c0_30, %c0_31] : memref<1x1x128xf32, #tpu.memory_space<vmem>>, vector<1x1x128xf32>
      tpu.vector_store %arg5[%c0_29, %c0_30, %c0_31], %34 {strides = array<i32>} : memref<1x1x128xf32, #tpu.memory_space<vmem>>, vector<1x1x128xf32>,
      %cst_32 = arith.constant 0.000000e+00 : f32
      %36 = vector.broadcast %cst_32 : f32 to vector<1x1x128xf32>
      %c0_33 = arith.constant 0 : index
      %c0_34 = arith.constant 0 : index
      %c0_35 = arith.constant 0 : index
      %37 = vector.load %arg6[%c0_33, %c0_34, %c0_35] : memref<1x1x128xf32, #tpu.memory_space<vmem>>, vector<1x1x128xf32>
      tpu.vector_store %arg6[%c0_33, %c0_34, %c0_35], %36 {strides = array<i32>} : memref<1x1x128xf32, #tpu.memory_space<vmem>>, vector<1x1x128xf32>,
    } else {
    }
    %c0 = arith.constant 0 : index
    %c0_1 = arith.constant 0 : index
    %3 = vector.load %arg3[%c0, %c0_1] : memref<2x128xf32, #tpu.memory_space<vmem>>, vector<2x128xf32>
    %c0_2 = arith.constant 0 : index
    %c0_3 = arith.constant 0 : index
    %4 = vector.load %arg2[%c0_2, %c0_3] : memref<2x128xf32, #tpu.memory_space<vmem>>, vector<2x128xf32>
    %5 = arith.subf %3, %4 : vector<2x128xf32>
    %c0_4 = arith.constant 0 : index
    %c0_5 = arith.constant 0 : index
    %c0_6 = arith.constant 0 : index
    %6 = vector.load %arg4[%c0_4, %c0_5, %c0_6] : memref<1x1x128xf32, #tpu.memory_space<vmem>>, vector<1x1x128xf32>
    %7 = vector.shape_cast %6 : vector<1x1x128xf32> to vector<1x128xf32>
    %cst = arith.constant dense<0.000000e+00> : vector<128xf32>
    %8 = vector.multi_reduction <add>, %3, %cst [0] : vector<2x128xf32> to vector<128xf32>
    %9 = vector.shape_cast %8 : vector<128xf32> to vector<1x128xf32>
    %10 = arith.addf %7, %9 : vector<1x128xf32>
    %c0_7 = arith.constant 0 : index
    %c0_8 = arith.constant 0 : index
    %c0_9 = arith.constant 0 : index
    %11 = vector.load %arg4[%c0_7, %c0_8, %c0_9] : memref<1x1x128xf32, #tpu.memory_space<vmem>>, vector<1x1x128xf32>
    %12 = vector.shape_cast %11 : vector<1x1x128xf32> to vector<1x128xf32>
    %13 = vector.shape_cast %10 : vector<1x128xf32> to vector<1x1x128xf32>
    tpu.vector_store %arg4[%c0_7, %c0_8, %c0_9], %13 {strides = array<i32>} : memref<1x1x128xf32, #tpu.memory_space<vmem>>, vector<1x1x128xf32>,
    %c0_10 = arith.constant 0 : index
    %c0_11 = arith.constant 0 : index
    %c0_12 = arith.constant 0 : index
    %14 = vector.load %arg5[%c0_10, %c0_11, %c0_12] : memref<1x1x128xf32, #tpu.memory_space<vmem>>, vector<1x1x128xf32>
    %15 = vector.shape_cast %14 : vector<1x1x128xf32> to vector<1x128xf32>
    %16 = arith.mulf %3, %3 : vector<2x128xf32>
    %cst_13 = arith.constant dense<0.000000e+00> : vector<128xf32>
    %17 = vector.multi_reduction <add>, %16, %cst_13 [0] : vector<2x128xf32> to vector<128xf32>
    %18 = vector.shape_cast %17 : vector<128xf32> to vector<1x128xf32>
    %19 = arith.addf %15, %18 : vector<1x128xf32>
    %c0_14 = arith.constant 0 : index
    %c0_15 = arith.constant 0 : index
    %c0_16 = arith.constant 0 : index
    %20 = vector.load %arg5[%c0_14, %c0_15, %c0_16] : memref<1x1x128xf32, #tpu.memory_space<vmem>>, vector<1x1x128xf32>
    %21 = vector.shape_cast %20 : vector<1x1x128xf32> to vector<1x128xf32>
    %22 = vector.shape_cast %19 : vector<1x128xf32> to vector<1x1x128xf32>
    tpu.vector_store %arg5[%c0_14, %c0_15, %c0_16], %22 {strides = array<i32>} : memref<1x1x128xf32, #tpu.memory_space<vmem>>, vector<1x1x128xf32>,
    %c0_17 = arith.constant 0 : index
    %c0_18 = arith.constant 0 : index
    %c0_19 = arith.constant 0 : index
    %23 = vector.load %arg6[%c0_17, %c0_18, %c0_19] : memref<1x1x128xf32, #tpu.memory_space<vmem>>, vector<1x1x128xf32>
    %24 = vector.shape_cast %23 : vector<1x1x128xf32> to vector<1x128xf32>
    %25 = arith.mulf %5, %5 : vector<2x128xf32>
    %cst_20 = arith.constant dense<0.000000e+00> : vector<128xf32>
    %26 = vector.multi_reduction <add>, %25, %cst_20 [0] : vector<2x128xf32> to vector<128xf32>
    %27 = vector.shape_cast %26 : vector<128xf32> to vector<1x128xf32>
    %28 = arith.addf %24, %27 : vector<1x128xf32>
    %c0_21 = arith.constant 0 : index
    %c0_22 = arith.constant 0 : index
    %c0_23 = arith.constant 0 : index
    %29 = vector.load %arg6[%c0_21, %c0_22, %c0_23] : memref<1x1x128xf32, #tpu.memory_space<vmem>>, vector<1x1x128xf32>
    %30 = vector.shape_cast %29 : vector<1x1x128xf32> to vector<1x128xf32>
    %31 = vector.shape_cast %28 : vector<1x128xf32> to vector<1x1x128xf32>
    tpu.vector_store %arg6[%c0_21, %c0_22, %c0_23], %31 {strides = array<i32>} : memref<1x1x128xf32, #tpu.memory_space<vmem>>, vector<1x1x128xf32>,
    return
  }
  func.func @transform_0(%arg0: i32, %arg1: i32) -> (i32, i32) {
    %c1_i32 = arith.constant 1 : i32
    %0 = arith.muli %arg0, %c1_i32 : i32
    %1 = arith.addi %0, %arg1 : i32
    %c0_i32 = arith.constant 0 : i32
    %2 = arith.minsi %1, %c0_i32 : i32
    %c0_i32_0 = arith.constant 0 : i32
    %c0_i32_1 = arith.constant 0 : i32
    return %2, %c0_i32_0 : i32, i32
  }
  func.func @transform_1(%arg0: i32, %arg1: i32) -> (i32, i32) {
    %c1_i32 = arith.constant 1 : i32
    %0 = arith.muli %arg0, %c1_i32 : i32
    %1 = arith.addi %0, %arg1 : i32
    %c0_i32 = arith.constant 0 : i32
    %2 = arith.minsi %1, %c0_i32 : i32
    %c0_i32_0 = arith.constant 0 : i32
    %c0_i32_1 = arith.constant 0 : i32
    return %2, %c0_i32_0 : i32, i32
  }
  func.func @transform_2(%arg0: i32, %arg1: i32) -> (i32, i32, i32) {
    %c0_i32 = arith.constant 0 : i32
    %c0_i32_0 = arith.constant 0 : i32
    %c0_i32_1 = arith.constant 0 : i32
    return %arg0, %c0_i32, %c0_i32_0 : i32, i32, i32
  }
  func.func @transform_3(%arg0: i32, %arg1: i32) -> (i32, i32, i32) {
    %c0_i32 = arith.constant 0 : i32
    %c0_i32_0 = arith.constant 0 : i32
    %c0_i32_1 = arith.constant 0 : i32
    return %arg0, %c0_i32, %c0_i32_0 : i32, i32, i32
  }
  func.func @transform_4(%arg0: i32, %arg1: i32) -> (i32, i32, i32) {
    %c0_i32 = arith.constant 0 : i32
    %c0_i32_0 = arith.constant 0 : i32
    %c0_i32_1 = arith.constant 0 : i32
    return %arg0, %c0_i32, %c0_i32_0 : i32, i32, i32
  }
}

</mosaic_0001>

<bundles_post_ra>
// kernel: dynamics_performance_loss.1
= control target key start
LH: loop header
LB: loop body
LE: loop exit
PB: predicated region body
PF: predicated region fallthrough
CT: control target
= control target key end

     0   :  { %vm79_vm0 = vcmask 1041408   ;;  %v136_v0 = vmov 0.0   ;;  %s198_s2 = inlined_call_operand.vmem [shape: f32[1,1,128], index: 2, kind: output, shape index: {0}]   ;;  %s199_s3 = inlined_call_operand.vmem [shape: f32[1,1,128], index: 3, kind: output, shape index: {1}]   ;;  %s200_s4 = inlined_call_operand.vmem [shape: f32[1,1,128], index: 4, kind: output, shape index: {2}]   ;;  %s201_s1 = inlined_call_operand.vmem [shape: f32[2,128], index: 1, kind: input, shape index: {}]   ;;  %s202_s0 = inlined_call_operand.vmem [shape: f32[2,128], index: 0, kind: input, shape index: {}]  }
   0x1   :  { %72 = vst [vmem:[%s198_s2] sm:$0x1] %v136_v0  ;;  %73 = vst [vmem:[%s199_s3] sm:$0x1] %v136_v0  ;;  %v75_v1 = vld [vmem:[%s201_s1] sm:$0x3] }
   0x2   :  { %74 = vst [vmem:[%s200_s4] sm:$0x1] %v136_v0  ;;  %v76_v2 = vld [vmem:[%s202_s0] sm:$0x3]  ;;  %v80_v3 = vsel %vm79_vm0, %v75_v1, 0.0  ;;  %v90_v4 = vmul.f32 %v75_v1, %v75_v1 }
   0x3   :  { %v77_v5 = vsub.f32 %v75_v1, %v76_v2  ;;  %v81_v6 = vrot.slane %v80_v3, 4 }
   0x4   :  { %v91_v7 = vsel %vm79_vm0, %v90_v4, 0.0 }
   0x5   :  { %v101_v8 = vmul.f32 %v77_v5, %v77_v5  ;;  %v82_v9 = vadd.f32 %v81_v6, %v80_v3  ;;  %v92_v10 = vrot.slane %v91_v7, 4 }
   0x7   :  { %v102_v11 = vsel %vm79_vm0, %v101_v8, 0.0  ;;  %v83_v12 = vrot.slane %v82_v9, 2  ;;  %v93_v13 = vadd.f32 %v92_v10, %v91_v7 }
   0x8   :  { %v103_v14 = vrot.slane %v102_v11, 4  ;;  %v78_v21 = vld [vmem:[%s198_s2] sm:$0x1] }
   0x9   :  { %v84_v15 = vadd.f32 %v83_v12, %v82_v9  ;;  %v94_v16 = vrot.slane %v93_v13, 2  ;;  %v89_v25 = vld [vmem:[%s199_s3] sm:$0x1] }
   0xa   :  { %v104_v17 = vadd.f32 %v103_v14, %v102_v11  ;;  %v100_v29 = vld [vmem:[%s200_s4] sm:$0x1] }
   0xb   :  { %v85_v18 = vrot.slane %v84_v15, 1  ;;  %v95_v19 = vadd.f32 %v94_v16, %v93_v13 }
   0xc   :  { %v105_v20 = vrot.slane %v104_v17, 2 }
   0xd   :  { %v86_v22 = vadd.f32 %v85_v18, %v84_v15  ;;  %v96_v23 = vrot.slane %v95_v19, 1 }
   0xe   :  { %v106_v24 = vadd.f32 %v105_v20, %v104_v17 }
   0xf   :  { %v87_v26 = vadd.f32 %v86_v22, %v78_v21  ;;  %v97_v27 = vadd.f32 %v96_v23, %v95_v19 }
  0x10   :  { %v107_v28 = vrot.slane %v106_v24, 1 }
  0x11   :  { %88 = vst [vmem:[%s198_s2] sm:$0x1] %v87_v26  ;;  %v98_v30 = vadd.f32 %v97_v27, %v89_v25 }
  0x12   :  { %v108_v31 = vadd.f32 %v107_v28, %v106_v24 }
  0x13   :  { %99 = vst [vmem:[%s199_s3] sm:$0x1] %v98_v30 }
  0x14   :  { %v109_v32 = vadd.f32 %v108_v31, %v100_v29 }
  0x16   :  { %110 = vst [vmem:[%s200_s4] sm:$0x1] %v109_v32 }

</bundles_post_ra>
